<compile_context>
chip_gen: v6e
topology: v6e:2x2x1
jax: 0.10.0
libtpu: 0.0.40
codegen_flags: <defaults>
</compile_context>

<pallas_src>
import jax
import jax.numpy as jnp
from jax import lax
from jax.experimental import pallas as pl
from jax.experimental.pallas import tpu as pltpu


def _sqexp_tile_kernel(params_ref, x_ref, y_ref, x2_ref, y2_ref, o_ref):
    """One (tm, tn) tile of K = sig2 * exp(-||x-y||^2 / (2*ell^2))."""
    sig2 = params_ref[0]
    inv_two_ell2 = params_ref[1]          # 1 / (2*ell^2), precomputed scalar

    x = x_ref[...].astype(jnp.float32)    # (tm, D)
    y = y_ref[...].astype(jnp.float32)    # (tn, D)

    # MXU consumes the RHS with the contraction on its last dim natively,
    # so no explicit y.T / relayout is materialized per grid step.
    cross = lax.dot_general(
        x, y, (((1,), (1,)), ((), ())), preferred_element_type=jnp.float32
    )                                      # (tm, tn)

    # |x|^2 (tm,1) + |y|^2 (1,tn) - 2 x.y ; clamp fp cancellation below zero.
    sqdist = jnp.maximum(x2_ref[...] + y2_ref[...] - 2.0 * cross, 0.0)

    o_ref[...] = (sig2 * jnp.exp(-sqdist * inv_two_ell2)).astype(o_ref.dtype)


def _round_up(a, b):
    return pl.cdiv(a, b) * b


def sqexp_forward(x, y, sig2, ell, *, tm=512, tn=512, out_dtype=jnp.float32):
    """Pallas SqExp.forward: x (N, D), y (M, D) -> K (N, M) = sig2*exp(-d^2/(2 ell^2))."""
    N, D = x.shape
    M, Dy = y.shape
    assert D == Dy, "last dimension should match"

    x = x.astype(jnp.float32)
    y = y.astype(jnp.float32)

    # Clamp tiles to the (aligned) problem size so small inputs do not
    # over-pad, then pad N/M up to tile multiples; padded rows are sliced off.
    tm = int(min(tm, _round_up(N, 8)))       # stays a multiple of 8
    tn = int(min(tn, _round_up(M, 128)))     # stays a multiple of 128
    Np = int(_round_up(N, tm))
    Mp = int(_round_up(M, tn))
    if Np != N:
        x = jnp.pad(x, ((0, Np - N), (0, 0)))
    if Mp != M:
        y = jnp.pad(y, ((0, Mp - M), (0, 0)))

    # Precompute squared norms; |y|^2 is fed lane-dense as a (1, Mp) row so the
    # kernel never does a sublane->lane transpose.
    x2 = jnp.sum(x * x, axis=-1, keepdims=True)          # (Np, 1)
    y2 = jnp.sum(y * y, axis=-1, keepdims=True).T        # (1, Mp)

    sig2_f = jnp.asarray(sig2, jnp.float32)
    ell_f = jnp.asarray(ell, jnp.float32)
    # Hoisted scalar: the only per-element transcendental left is the exp.
    params = jnp.stack([sig2_f, 0.5 / (ell_f * ell_f)])  # (2,) scalars in SMEM

    # j (columns) is the innermost grid axis -> the x tile index map (i, 0) is
    # constant across consecutive steps and Pallas skips its re-DMA.  Keep
    # this ordering if refactoring.
    grid = (Np // tm, Mp // tn)

    cost = pl.CostEstimate(
        flops=2 * Np * Mp * D + 4 * Np * Mp,              # MXU cross + epilogue
        transcendentals=Np * Mp,                          # one exp per element
        bytes_accessed=4 * (Np * Mp + (Np + Mp) * (D + 1)),
    )

    out = pl.pallas_call(
        _sqexp_tile_kernel,
        out_shape=jax.ShapeDtypeStruct((Np, Mp), out_dtype),
        grid=grid,
        in_specs=[
            pl.BlockSpec(memory_space=pltpu.MemorySpace.SMEM),       # params
            pl.BlockSpec((tm, D), lambda i, j: (i, 0)),              # x tile
            pl.BlockSpec((tn, D), lambda i, j: (j, 0)),              # y tile
            pl.BlockSpec((tm, 1), lambda i, j: (i, 0)),              # |x|^2
            pl.BlockSpec((1, tn), lambda i, j: (0, j)),              # |y|^2
        ],
        out_specs=pl.BlockSpec((tm, tn), lambda i, j: (i, j)),
        compiler_params=pltpu.CompilerParams(
            dimension_semantics=("parallel", "parallel"),
            # 512x512 f32 tiles (2 MiB double-buffered output + small temps)
            # fit the default scoped VMEM on v5e/v6e/v7x; only set
            # vmem_limit_bytes here if raising tm/tn to 1024 (v6e/v5e).
        ),
        cost_estimate=cost,
    )(params, x, y, x2, y2)

    return out[:N, :M]


def sqexp_reference(x, y, sig2, ell):
    """Plain-JAX transcription of the PyTorch SqExp.forward, for verification."""
    diff = (x[:, None, :] - y[None, :, :]) / ell
    sqdist = jnp.sum(diff * diff, axis=-1)
    return sig2 * jnp.exp(-sqdist / 2.0)


if __name__ == "__main__":
    key = jax.random.PRNGKey(0)
    kx, ky, kx2, ky2 = jax.random.split(key, 4)

    sig2, ell = 1.3, 0.7          # params = (sig2, ell), as in the module
    D = 8

    # Tile-aligned small problem.
    x = jax.random.normal(kx, (128, D), dtype=jnp.float32)
    y = jax.random.normal(ky, (256, D), dtype=jnp.float32)
    K = jax.block_until_ready(sqexp_forward(x, y, sig2, ell))
    K_ref = sqexp_reference(x, y, sig2, ell)
    assert K.shape == (128, 256)
    assert jnp.allclose(K, K_ref, atol=1e-4, rtol=1e-4), "mismatch (aligned case)"

    # Non-tile-aligned problem (exercises the padding + slice path).
    xa = jax.random.normal(kx2, (100, D), dtype=jnp.float32)
    ya = jax.random.normal(ky2, (200, D), dtype=jnp.float32)
    Ka = jax.block_until_ready(sqexp_forward(xa, ya, sig2, ell))
    Ka_ref = sqexp_reference(xa, ya, sig2, ell)
    assert Ka.shape == (100, 200)
    assert jnp.allclose(Ka, Ka_ref, atol=1e-4, rtol=1e-4), "mismatch (padded case)"

    print("KERNEL_OK")
</pallas_src>

<mosaic_0001>
module attributes {stable_mosaic.version = 11 : i64} {
  func.func @_sqexp_tile_kernel(%arg0: i32, %arg1: i32, %arg2: memref<2xf32, #tpu.memory_space<smem>>, %arg3: memref<128x8xf32, #tpu.memory_space<vmem>>, %arg4: memref<256x8xf32, #tpu.memory_space<vmem>>, %arg5: memref<128x1xf32, #tpu.memory_space<vmem>>, %arg6: memref<1x256xf32, #tpu.memory_space<vmem>>, %arg7: memref<128x256xf32, #tpu.memory_space<vmem>>) attributes {dimension_semantics = [#tpu.dimension_semantics<parallel>, #tpu.dimension_semantics<parallel>], iteration_bounds = array<i64: 1, 1>, scalar_prefetch = 0 : i64, scratch_operands = 0 : i64, tpu.core_type = #tpu.core_type<tc>, window_params = [{transform_indices = @transform_0, window_bounds = array<i64: 2>}, {transform_indices = @transform_1, window_bounds = array<i64: 128, 8>}, {transform_indices = @transform_2, window_bounds = array<i64: 256, 8>}, {transform_indices = @transform_3, window_bounds = array<i64: 128, 1>}, {transform_indices = @transform_4, window_bounds = array<i64: 1, 256>}, {transform_indices = @transform_5, window_bounds = array<i64: 128, 256>}]} {
    %c0 = arith.constant 0 : index
    %0 = memref.load %arg2[%c0] : memref<2xf32, #tpu.memory_space<smem>>
    %c1 = arith.constant 1 : index
    %1 = memref.load %arg2[%c1] : memref<2xf32, #tpu.memory_space<smem>>
    %c0_0 = arith.constant 0 : index
    %c0_1 = arith.constant 0 : index
    %2 = vector.load %arg3[%c0_0, %c0_1] : memref<128x8xf32, #tpu.memory_space<vmem>>, vector<128x8xf32>
    %c0_2 = arith.constant 0 : index
    %c0_3 = arith.constant 0 : index
    %3 = vector.load %arg4[%c0_2, %c0_3] : memref<256x8xf32, #tpu.memory_space<vmem>>, vector<256x8xf32>
    %cst = arith.constant dense<0.000000e+00> : vector<128x256xf32>
    %4 = tpu.matmul %2, %3, %cst {dimension_numbers = #tpu.dot_dimension_numbers<[1], [1], [0], [0], [0, 0, 1, 0], [], []>} : vector<128x8xf32>, vector<256x8xf32>, vector<128x256xf32> -> vector<128x256xf32>
    %c0_4 = arith.constant 0 : index
    %c0_5 = arith.constant 0 : index
    %5 = vector.load %arg5[%c0_4, %c0_5] : memref<128x1xf32, #tpu.memory_space<vmem>>, vector<128x1xf32>
    %c0_6 = arith.constant 0 : index
    %c0_7 = arith.constant 0 : index
    %6 = vector.load %arg6[%c0_6, %c0_7] : memref<1x256xf32, #tpu.memory_space<vmem>>, vector<1x256xf32>
    %7 = vector.broadcast %5 : vector<128x1xf32> to vector<128x256xf32>
    %8 = vector.broadcast %6 : vector<1x256xf32> to vector<128x256xf32>
    %9 = arith.addf %7, %8 : vector<128x256xf32>
    %cst_8 = arith.constant 2.000000e+00 : f32
    %10 = vector.broadcast %cst_8 : f32 to vector<128x256xf32>
    %11 = arith.mulf %10, %4 : vector<128x256xf32>
    %12 = arith.subf %9, %11 : vector<128x256xf32>
    %cst_9 = arith.constant 0.000000e+00 : f32
    %13 = vector.broadcast %cst_9 : f32 to vector<128x256xf32>
    %14 = arith.maximumf %12, %13 : vector<128x256xf32>
    %cst_10 = arith.constant 0.000000e+00 : f32
    %15 = vector.broadcast %cst_10 : f32 to vector<128x256xf32>
    %16 = arith.subf %15, %14 : vector<128x256xf32>
    %17 = vector.broadcast %1 : f32 to vector<128x256xf32>
    %18 = arith.mulf %16, %17 : vector<128x256xf32>
    %19 = math.exp %18 : vector<128x256xf32>
    %20 = vector.broadcast %0 : f32 to vector<128x256xf32>
    %21 = arith.mulf %20, %19 : vector<128x256xf32>
    %c0_11 = arith.constant 0 : index
    %c0_12 = arith.constant 0 : index
    %22 = vector.load %arg7[%c0_11, %c0_12] : memref<128x256xf32, #tpu.memory_space<vmem>>, vector<128x256xf32>
    tpu.vector_store %arg7[%c0_11, %c0_12], %21 {strides = array<i32>} : memref<128x256xf32, #tpu.memory_space<vmem>>, vector<128x256xf32>,
    return
  }
  func.func @transform_0(%arg0: i32, %arg1: i32) -> i32 {
    %c0_i32 = arith.constant 0 : i32
    %c0_i32_0 = arith.constant 0 : i32
    return %c0_i32 : i32
  }
  func.func @transform_1(%arg0: i32, %arg1: i32) -> (i32, i32) {
    %c0_i32 = arith.constant 0 : i32
    %c0_i32_0 = arith.constant 0 : i32
    return %arg0, %c0_i32 : i32, i32
  }
  func.func @transform_2(%arg0: i32, %arg1: i32) -> (i32, i32) {
    %c0_i32 = arith.constant 0 : i32
    %c0_i32_0 = arith.constant 0 : i32
    return %arg1, %c0_i32 : i32, i32
  }
  func.func @transform_3(%arg0: i32, %arg1: i32) -> (i32, i32) {
    %c0_i32 = arith.constant 0 : i32
    %c0_i32_0 = arith.constant 0 : i32
    return %arg0, %c0_i32 : i32, i32
  }
  func.func @transform_4(%arg0: i32, %arg1: i32) -> (i32, i32) {
    %c0_i32 = arith.constant 0 : i32
    %c0_i32_0 = arith.constant 0 : i32
    return %c0_i32, %arg1 : i32, i32
  }
  func.func @transform_5(%arg0: i32, %arg1: i32) -> (i32, i32) {
    %c0_i32 = arith.constant 0 : i32
    return %arg0, %arg1 : i32, i32
  }
}

</mosaic_0001>

<bundles_post_ra>
// kernel: tpu_custom_call.1
= control target key start
LH: loop header
LB: loop body
LE: loop exit
PB: predicated region body
PF: predicated region fallthrough
CT: control target
= control target key end

     0   :  { %10 = vsyncpa [#allocation4], 0  ;;  %s1578_s0 = inlined_call_operand.vmem [shape: f32[2], index: 0, kind: input, shape index: {}]   ;;  %s1579_s1 = inlined_call_operand.vmem [shape: f32[128,8], index: 1, kind: input, shape index: {}]   ;;  %s1580_s2 = inlined_call_operand.vmem [shape: f32[256,8], index: 2, kind: input, shape index: {}]   ;;  %s1581_s3 = inlined_call_operand.vmem [shape: f32[128,1], index: 3, kind: input, shape index: {}]   ;;  %s1582_s4 = inlined_call_operand.vmem [shape: f32[1,256], index: 4, kind: input, shape index: {}]   ;;  %s1583_s5 = inlined_call_operand.hbm [shape: f32[128,256], index: 5, kind: output, shape index: {}]  }
   0x1   :  { %11 = vsyncpa [#allocation3], 0  ;;  %s18_s20 = sshll.u32 %s1578_s0, 4  ;;  %s19_s20 = int_to_ptr.vmem [resolvable:$true] %s18_s20 }
   0x2   :  { %s1053_s21 = scalar_lea.vmem %s19_s20, 16  ;;  %p1058_p1 = scmp.lt.s32.totalorder %s19_s20, %s19_s20 }
   0x3   :  { %p1054_p0 = scmp.ne.s32.totalorder %s19_s20, %s1053_s21  ;;  %p1059_p2 = scmp.lt.s32.totalorder %s1053_s21, %s1053_s21 }
   0x5   :  { %p1060_p3 = por %p1059_p2, %p1058_p1 }
   0x7   :  { %p1061_p4 = pnand %p1060_p3, %p1054_p0 }
   0x9   :  { %1064 = shalt.err (!%p1061_p4)
}
   0xa   :  { %s1089_s22 = smov [#allocation2]  }
   0xb   :  { %21 = dma.vmem_to_smem %s19_s20, 16, %s1089_s22, [#allocation4]  }
   0xc   :  { %1085 = dma.done.wait [#allocation4], 16  }
   0xd   :  { %1086 = vsyncadd [#allocation4], 4294967280 }
   0xe   :  { %33 = sfence }
   0xf   :  { %v83_v0 = vld [vmem:[%s1580_s2 + $0xf8] sm:$0xff]  ;;  %vm84_vm0 = vcmask 64512   ;;  %v82_v2 = vld [vmem:[%s1580_s2 + $0xf0] sm:$0xff]  ;;  %v81_v4 = vld [vmem:[%s1580_s2 + $0xe8] sm:$0xff]  ;;  %v1090_v5 = vmov 0   ;;  %s34_s18 = sld [smem:[#allocation2]] }
  0x10   :  { %v67_v1 = vld [vmem:[%s1580_s2 + $0x78] sm:$0xff]  ;;  %886 = vmatprep.subr.msk.mxu0 %vm84_vm0, %v83_v0  ;;  %950 = vmatprep.subr.msk.mxu1 %vm84_vm0, %v83_v0  ;;  %v66_v3 = vld [vmem:[%s1580_s2 + $0x70] sm:$0xff]  ;;  %v65_v6 = vld [vmem:[%s1580_s2 + $0x68] sm:$0xff] }
  0x11   :  { %887 = vmatpush3.xpose.msk.msra.mxu0 %vm84_vm0, %v67_v1  ;;  %966 = vmatpush3.xpose.msk.msra.mxu1 %vm84_vm0, %v67_v1  ;;  %v80_v7 = vld [vmem:[%s1580_s2 + $0xe0] sm:$0xff]  ;;  %v79_v11 = vld [vmem:[%s1580_s2 + $0xd8] sm:$0xff]  ;;  %v78_v13 = vld [vmem:[%s1580_s2 + $0xd0] sm:$0xff] }
  0x12   :  { %888 = vmatprep.subr.msk.mxu0 %vm84_vm0, %v82_v2  ;;  %951 = vmatprep.subr.msk.mxu1 %vm84_vm0, %v82_v2  ;;  %v1163_v8 = vld [vmem:[%s1579_s1] sm:$0xff]  ;;  %v63_v12 = vld [vmem:[%s1580_s2 + $0x58] sm:$0xff]  ;;  %v392_v14 = vld [vmem:[%s1581_s3 + $0x10] sm:$0xff] }
  0x13   :  { %988 = vset.pattern.permute.xlu1 %v1090_v5  ;;  %987 = vset.pattern.permute.xlu0 %v1090_v5  ;;  %v64_v9 = vld [vmem:[%s1580_s2 + $0x60] sm:$0xff]  ;;  %v393_v16 = vld [vmem:[%s1581_s3 + $0x18] sm:$0xff]  ;;  %v391_v17 = vld [vmem:[%s1581_s3 + $0x8] sm:$0xff] }
  0x14   :  { %v1173_v10 = vld [vmem:[%s1579_s1 + $0x40] sm:$0xff]  ;;  %918 = vmatprep.mubr.msk.f32.mxu0 %vm84_vm0, %v1163_v8  ;;  %419 = vperm.xlu1 %988, %v392_v14   ;;  %v62_v18 = vld [vmem:[%s1580_s2 + $0x50] sm:$0xff]  ;;  %v77_v19 = vld [vmem:[%s1580_s2 + $0xc8] sm:$0xff] }
  0x15   :  { %889 = vmatpush3.xpose.msk.msra.mxu0 %vm84_vm0, %v66_v3  ;;  %967 = vmatpush3.xpose.msk.msra.mxu1 %vm84_vm0, %v66_v3  ;;  %v390_v15 = vld [vmem:[%s1581_s3] sm:$0xff]  ;;  %v395_v20 = vld [vmem:[%s1581_s3 + $0x28] sm:$0xff]  ;;  %v397_v24 = vld [vmem:[%s1581_s3 + $0x38] sm:$0xff] }
  0x16   :  { %890 = vmatprep.subr.msk.mxu0 %vm84_vm0, %v81_v4  ;;  %952 = vmatprep.subr.msk.mxu1 %vm84_vm0, %v81_v4  ;;  %v394_v21 = vld [vmem:[%s1581_s3 + $0x20] sm:$0xff]  ;;  %v61_v22 = vld [vmem:[%s1580_s2 + $0x48] sm:$0xff]  ;;  %v396_v25 = vld [vmem:[%s1581_s3 + $0x30] sm:$0xff] }
  0x17   :  { %934 = vmatprep.mubr.msk.f32.mxu1 %vm84_vm0, %v1173_v10  ;;  %409 = vperm.xlu0 %987, %v390_v15   ;;  %v76_v23 = vld [vmem:[%s1580_s2 + $0xc0] sm:$0xff]  ;;  %v75_v27 = vld [vmem:[%s1580_s2 + $0xb8] sm:$0xff]  ;;  %v399_v28 = vld [vmem:[%s1581_s3 + $0x48] sm:$0xff] }
  0x18   :  { %424 = vperm.xlu1 %988, %v393_v16   ;;  %v60_v26 = vld [vmem:[%s1580_s2 + $0x40] sm:$0xff]  ;;  %v59_v30 = vld [vmem:[%s1580_s2 + $0x38] sm:$0xff]  ;;  %v74_v31 = vld [vmem:[%s1580_s2 + $0xb0] sm:$0xff] }
  0x19   :  { %891 = vmatpush3.xpose.msk.msra.mxu0 %vm84_vm0, %v65_v6  ;;  %968 = vmatpush3.xpose.msk.msra.mxu1 %vm84_vm0, %v65_v6  ;;  %v398_v29 = vld [vmem:[%s1581_s3 + $0x40] sm:$0xff]  ;;  %v401_v32 = vld [vmem:[%s1581_s3 + $0x58] sm:$0xff]  ;;  %v400_v33 = vld [vmem:[%s1581_s3 + $0x50] sm:$0xff] }
  0x1a   :  { %892 = vmatprep.subr.msk.mxu0 %vm84_vm0, %v80_v7  ;;  %953 = vmatprep.subr.msk.mxu1 %vm84_vm0, %v80_v7  ;;  %v58_v34 = vld [vmem:[%s1580_s2 + $0x30] sm:$0xff]  ;;  %v73_v35 = vld [vmem:[%s1580_s2 + $0xa8] sm:$0xff]  ;;  %v402_v37 = vld [vmem:[%s1581_s3 + $0x60] sm:$0xff] }
  0x1b   :  { %414 = vperm.xlu0 %987, %v391_v17   ;;  %v403_v36 = vld [vmem:[%s1581_s3 + $0x68] sm:$0xff]  ;;  %v72_v39 = vld [vmem:[%s1580_s2 + $0xa0] sm:$0xff]  ;;  %v405_v40 = vld [vmem:[%s1581_s3 + $0x78] sm:$0xff] }
  0x1c   :  { %434 = vperm.xlu1 %988, %v395_v20   ;;  %v57_v38 = vld [vmem:[%s1580_s2 + $0x28] sm:$0xff]  ;;  %v404_v41 = vld [vmem:[%s1581_s3 + $0x70] sm:$0xff]  ;;  %v56_v42 = vld [vmem:[%s1580_s2 + $0x20] sm:$0xff] }
  0x1d   :  { %893 = vmatpush3.xpose.msk.msra.mxu0 %vm84_vm0, %v64_v9  ;;  %969 = vmatpush3.xpose.msk.msra.mxu1 %vm84_vm0, %v64_v9  ;;  %v71_v43 = vld [vmem:[%s1580_s2 + $0x98] sm:$0xff]  ;;  %v70_v45 = vld [vmem:[%s1580_s2 + $0x90] sm:$0xff]  ;;  %v69_v47 = vld [vmem:[%s1580_s2 + $0x88] sm:$0xff]  ;;  %v488_v9 = vlaneseq }
  0x1e   :  { %894 = vmatprep.subr.msk.mxu0 %vm84_vm0, %v79_v11  ;;  %954 = vmatprep.subr.msk.mxu1 %vm84_vm0, %v79_v11  ;;  %v55_v44 = vld [vmem:[%s1580_s2 + $0x18] sm:$0xff]  ;;  %v54_v46 = vld [vmem:[%s1580_s2 + $0x10] sm:$0xff]  ;;  %v53_v48 = vld [vmem:[%s1580_s2 + $0x8] sm:$0xff] }
  0x1f   :  { %429 = vperm.xlu0 %987, %v394_v21   ;;  %v68_v49 = vld [vmem:[%s1580_s2 + $0x80] sm:$0xff]  ;;  %v37_v51 = vld [vmem:[%s1579_s1 + $0x8] sm:$0xff]  ;;  %v38_v53 = vld [vmem:[%s1579_s1 + $0x10] sm:$0xff]  ;;  %v489_v11 = vshrl.u32 %v488_v9, 7 }
  0x20   :  { %444 = vperm.xlu1 %988, %v397_v24   ;;  %v52_v50 = vld [vmem:[%s1580_s2] sm:$0xff]  ;;  %v45_v52 = vld [vmem:[%s1579_s1 + $0x48] sm:$0xff]  ;;  %v46_v54 = vld [vmem:[%s1579_s1 + $0x50] sm:$0xff] }
  0x21   :  { %895 = vmatpush3.xpose.msk.msra.mxu0 %vm84_vm0, %v63_v12  ;;  %970 = vmatpush3.xpose.msk.msra.mxu1 %vm84_vm0, %v63_v12  ;;  %v39_v55 = vld [vmem:[%s1579_s1 + $0x18] sm:$0xff]  ;;  %v40_v57 = vld [vmem:[%s1579_s1 + $0x20] sm:$0xff]  ;;  %v41_v59 = vld [vmem:[%s1579_s1 + $0x28] sm:$0xff]  ;;  %v494_v14 = vsub.s32 1, %v489_v11 }
  0x22   :  { %896 = vmatprep.subr.msk.mxu0 %vm84_vm0, %v78_v13  ;;  %955 = vmatprep.subr.msk.mxu1 %vm84_vm0, %v78_v13  ;;  %v47_v56 = vld [vmem:[%s1579_s1 + $0x58] sm:$0xff]  ;;  %v48_v58 = vld [vmem:[%s1579_s1 + $0x60] sm:$0xff]  ;;  %v49_v60 = vld [vmem:[%s1579_s1 + $0x68] sm:$0xff]  ;;  %v490_v13 = vsub.s32 0, %v489_v11 }
  0x23   :  { %439 = vperm.xlu0 %987, %v396_v25   ;;  %v42_v61 = vld [vmem:[%s1579_s1 + $0x30] sm:$0xff]  ;;  %v43_v63 = vld [vmem:[%s1579_s1 + $0x38] sm:$0xff]  ;;  %v406_v15 = vld [vmem:[%s1582_s4] sm:$0x3]  ;;  %s1091_s4 = smov [#allocation5]  }
  0x24   :  { %454 = vperm.xlu1 %988, %v399_v28   ;;  %v50_v62 = vld [vmem:[%s1579_s1 + $0x70] sm:$0xff]  ;;  %v51_v0 = vld [vmem:[%s1579_s1 + $0x78] sm:$0xff]  ;;  %s837_s1 = sld [smem:[#allocation2 + $0x1]]  ;;  %s825_s21 = sshll.u32 %s1091_s4, 4  ;;  %s826_s21 = int_to_ptr.vmem [resolvable:$true] %s825_s21 }
  0x25   :  { %897 = vmatpush3.xpose.msk.msra.mxu0 %vm84_vm0, %v62_v18  ;;  %971 = vmatpush3.xpose.msk.msra.mxu1 %vm84_vm0, %v62_v18  ;;  %v491_v18 = vrot.slane %v406_v15, %v490_v13  ;;  %s1065_s2 = scalar_lea.vmem %s826_s21, 4096  ;;  %p1070_p6 = scmp.lt.s32.totalorder %s826_s21, %s826_s21 }
  0x26   :  { %898 = vmatprep.subr.msk.mxu0 %vm84_vm0, %v77_v19  ;;  %956 = vmatprep.subr.msk.mxu1 %vm84_vm0, %v77_v19  ;;  %v495_v19 = vrot.slane %v406_v15, %v494_v14  ;;  %p1066_p5 = scmp.ne.s32.totalorder %s826_s21, %s1065_s2  ;;  %p1071_p7 = scmp.lt.s32.totalorder %s1065_s2, %s1065_s2 }
  0x27   :  { %449 = vperm.xlu0 %987, %v398_v29  }
  0x28   :  { %464 = vperm.xlu1 %988, %v401_v32   ;;  %p1072_p8 = por %p1071_p7, %p1070_p6 }
  0x29   :  { %899 = vmatpush3.xpose.msk.msra.mxu0 %vm84_vm0, %v61_v22  ;;  %972 = vmatpush3.xpose.msk.msra.mxu1 %vm84_vm0, %v61_v22 }
  0x2a   :  { %900 = vmatprep.subr.msk.mxu0 %vm84_vm0, %v76_v23  ;;  %957 = vmatprep.subr.msk.mxu1 %vm84_vm0, %v76_v23  ;;  %v1428_v22 = vstv %s837_s1  ;;  %p1073_p9 = pnand %p1072_p8, %p1066_p5 }
  0x2b   :  { %459 = vperm.xlu0 %987, %v400_v33  }
  0x2c   :  { %474 = vperm.xlu1 %988, %v403_v36  }
  0x2d   :  { %901 = vmatpush3.xpose.msk.msra.mxu0 %vm84_vm0, %v60_v26  ;;  %973 = vmatpush3.xpose.msk.msra.mxu1 %vm84_vm0, %v60_v26  ;;  %v1432_v26 = vstv %s34_s18 }
  0x2e   :  { %902 = vmatprep.subr.msk.mxu0 %vm84_vm0, %v75_v27  ;;  %958 = vmatprep.subr.msk.mxu1 %vm84_vm0, %v75_v27 }
  0x2f   :  { %469 = vperm.xlu0 %987, %v402_v37  }
  0x30   :  { %484 = vperm.xlu1 %988, %v405_v40  }
  0x31   :  { %903 = vmatpush3.xpose.msk.msra.mxu0 %vm84_vm0, %v59_v30  ;;  %974 = vmatpush3.xpose.msk.msra.mxu1 %vm84_vm0, %v59_v30 }
  0x32   :  { %904 = vmatprep.subr.msk.mxu0 %vm84_vm0, %v74_v31  ;;  %959 = vmatprep.subr.msk.mxu1 %vm84_vm0, %v74_v31 }
  0x33   :  { %479 = vperm.xlu0 %987, %v404_v41  }
  0x35   :  { %905 = vmatpush3.xpose.msk.msra.mxu0 %vm84_vm0, %v58_v34  ;;  %975 = vmatpush3.xpose.msk.msra.mxu1 %vm84_vm0, %v58_v34 }
  0x36   :  { %906 = vmatprep.subr.msk.mxu0 %vm84_vm0, %v73_v35  ;;  %960 = vmatprep.subr.msk.mxu1 %vm84_vm0, %v73_v35 }
  0x39   :  { %907 = vmatpush3.xpose.msk.msra.mxu0 %vm84_vm0, %v57_v38  ;;  %976 = vmatpush3.xpose.msk.msra.mxu1 %vm84_vm0, %v57_v38 }
  0x3a   :  { %908 = vmatprep.subr.msk.mxu0 %vm84_vm0, %v72_v39  ;;  %961 = vmatprep.subr.msk.mxu1 %vm84_vm0, %v72_v39 }
  0x3d   :  { %909 = vmatpush3.xpose.msk.msra.mxu0 %vm84_vm0, %v56_v42  ;;  %977 = vmatpush3.xpose.msk.msra.mxu1 %vm84_vm0, %v56_v42 }
  0x3e   :  { %910 = vmatprep.subr.msk.mxu0 %vm84_vm0, %v71_v43  ;;  %962 = vmatprep.subr.msk.mxu1 %vm84_vm0, %v71_v43 }
  0x41   :  { %911 = vmatpush3.xpose.msk.msra.mxu0 %vm84_vm0, %v55_v44  ;;  %978 = vmatpush3.xpose.msk.msra.mxu1 %vm84_vm0, %v55_v44 }
  0x42   :  { %912 = vmatprep.subr.msk.mxu0 %vm84_vm0, %v70_v45  ;;  %963 = vmatprep.subr.msk.mxu1 %vm84_vm0, %v70_v45 }
  0x45   :  { %913 = vmatpush3.xpose.msk.msra.mxu0 %vm84_vm0, %v54_v46  ;;  %979 = vmatpush3.xpose.msk.msra.mxu1 %vm84_vm0, %v54_v46 }
  0x46   :  { %914 = vmatprep.subr.msk.mxu0 %vm84_vm0, %v69_v47  ;;  %964 = vmatprep.subr.msk.mxu1 %vm84_vm0, %v69_v47 }
  0x49   :  { %915 = vmatpush3.xpose.msk.msra.mxu0 %vm84_vm0, %v53_v48  ;;  %980 = vmatpush3.xpose.msk.msra.mxu1 %vm84_vm0, %v53_v48 }
  0x4a   :  { %916 = vmatprep.subr.msk.mxu0 %vm84_vm0, %v68_v49  ;;  %965 = vmatprep.subr.msk.mxu1 %vm84_vm0, %v68_v49 }
  0x4d   :  { %917 = vmatpush3.xpose.msk.msra.mxu0 %vm84_vm0, %v52_v50  ;;  %981 = vmatpush3.xpose.msk.msra.mxu1 %vm84_vm0, %v52_v50 }
  0x50   :  { %919 = vmatmul.mubr.msk.f32.vlgmr.msra.gmra.mxu0 %vm84_vm0, %v1163_v8  ;;  %935 = vmatmul.mubr.msk.f32.vlgmr.msra.gmra.mxu1 %vm84_vm0, %v1173_v10 }
  0x51   :  { %920 = vmatprep.mubr.msk.f32.mxu0 %vm84_vm0, %v37_v51  ;;  %936 = vmatprep.mubr.msk.f32.mxu1 %vm84_vm0, %v45_v52 }
  0x54   :  { %921 = vmatmul.mubr.msk.f32.gmra.mxu0 %vm84_vm0, %v37_v51  ;;  %937 = vmatmul.mubr.msk.f32.gmra.mxu1 %vm84_vm0, %v45_v52 }
  0x55   :  { %922 = vmatprep.mubr.msk.f32.mxu0 %vm84_vm0, %v38_v53  ;;  %938 = vmatprep.mubr.msk.f32.mxu1 %vm84_vm0, %v46_v54 }
  0x58   :  { %923 = vmatmul.mubr.msk.f32.gmra.mxu0 %vm84_vm0, %v38_v53  ;;  %939 = vmatmul.mubr.msk.f32.gmra.mxu1 %vm84_vm0, %v46_v54 }
  0x59   :  { %924 = vmatprep.mubr.msk.f32.mxu0 %vm84_vm0, %v39_v55  ;;  %940 = vmatprep.mubr.msk.f32.mxu1 %vm84_vm0, %v47_v56 }
  0x5c   :  { %925 = vmatmul.mubr.msk.f32.gmra.mxu0 %vm84_vm0, %v39_v55  ;;  %941 = vmatmul.mubr.msk.f32.gmra.mxu1 %vm84_vm0, %v47_v56 }
  0x5d   :  { %926 = vmatprep.mubr.msk.f32.mxu0 %vm84_vm0, %v40_v57  ;;  %942 = vmatprep.mubr.msk.f32.mxu1 %vm84_vm0, %v48_v58 }
  0x60   :  { %927 = vmatmul.mubr.msk.f32.gmra.mxu0 %vm84_vm0, %v40_v57  ;;  %943 = vmatmul.mubr.msk.f32.gmra.mxu1 %vm84_vm0, %v48_v58 }
  0x61   :  { %928 = vmatprep.mubr.msk.f32.mxu0 %vm84_vm0, %v41_v59  ;;  %944 = vmatprep.mubr.msk.f32.mxu1 %vm84_vm0, %v49_v60 }
  0x64   :  { %929 = vmatmul.mubr.msk.f32.gmra.mxu0 %vm84_vm0, %v41_v59  ;;  %945 = vmatmul.mubr.msk.f32.gmra.mxu1 %vm84_vm0, %v49_v60 }
  0x65   :  { %930 = vmatprep.mubr.msk.f32.mxu0 %vm84_vm0, %v42_v61  ;;  %946 = vmatprep.mubr.msk.f32.mxu1 %vm84_vm0, %v50_v62 }
  0x68   :  { %931 = vmatmul.mubr.msk.f32.gmra.mxu0 %vm84_vm0, %v42_v61  ;;  %947 = vmatmul.mubr.msk.f32.gmra.mxu1 %vm84_vm0, %v50_v62 }
  0x69   :  { %932 = vmatprep.mubr.msk.f32.mxu0 %vm84_vm0, %v43_v63  ;;  %948 = vmatprep.mubr.msk.f32.mxu1 %vm84_vm0, %v51_v0 }
  0x6c   :  { %933 = vmatmul.mubr.msk.f32.gmra.mxu0 %vm84_vm0, %v43_v63  ;;  %949 = vmatmul.mubr.msk.f32.gmra.mxu1 %vm84_vm0, %v51_v0 }
  0x8f   :  { %v420_v1 = vpop.permute.xlu1 %419 }
  0x90   :  { %v1426_v20 = vadd.f32 %v491_v18, %v420_v1  ;;  %v1430_v23 = vadd.f32 %v495_v19, %v420_v1 }
  0x92   :  { %v410_v2 = vpop.permute.xlu0 %409 }
  0x93   :  { %v425_v3 = vpop.permute.xlu1 %424  ;;  %v498_v24 = vadd.f32 %v491_v18, %v410_v2  ;;  %v499_v25 = vadd.f32 %v495_v19, %v410_v2 }
  0x94   :  { %v1434_v27 = vadd.f32 %v491_v18, %v425_v3  ;;  %v1436_v28 = vadd.f32 %v495_v19, %v425_v3 }
  0x96   :  { %v415_v4 = vpop.permute.xlu0 %414 }
  0x97   :  { %v435_v5 = vpop.permute.xlu1 %434  ;;  %v1438_v29 = vadd.f32 %v491_v18, %v415_v4  ;;  %v1440_v30 = vadd.f32 %v495_v19, %v415_v4 }
  0x98   :  { %v1442_v32 = vadd.f32 %v491_v18, %v435_v5  ;;  %v1444_v33 = vadd.f32 %v495_v19, %v435_v5 }
  0x9a   :  { %v430_v6 = vpop.permute.xlu0 %429 }
  0x9b   :  { %v445_v7 = vpop.permute.xlu1 %444  ;;  %v1446_v34 = vadd.f32 %v491_v18, %v430_v6  ;;  %v1448_v35 = vadd.f32 %v495_v19, %v430_v6 }
  0x9c   :  { %v1450_v36 = vadd.f32 %v491_v18, %v445_v7  ;;  %v1452_v37 = vadd.f32 %v495_v19, %v445_v7 }
  0x9e   :  { %v440_v8 = vpop.permute.xlu0 %439 }
  0x9f   :  { %v455_v10 = vpop.permute.xlu1 %454  ;;  %v1454_v38 = vadd.f32 %v491_v18, %v440_v8  ;;  %v1456_v40 = vadd.f32 %v495_v19, %v440_v8 }
  0xa0   :  { %v516_v41 = vadd.f32 %v491_v18, %v455_v10  ;;  %v1458_v42 = vadd.f32 %v495_v19, %v455_v10 }
  0xa2   :  { %v450_v12 = vpop.permute.xlu0 %449 }
  0xa3   :  { %v465_v16 = vpop.permute.xlu1 %464  ;;  %v514_v39 = vadd.f32 %v491_v18, %v450_v12  ;;  %v515_v43 = vadd.f32 %v495_v19, %v450_v12 }
  0xa4   :  { %v1460_v46 = vadd.f32 %v491_v18, %v465_v16  ;;  %v1462_v47 = vadd.f32 %v495_v19, %v465_v16 }
  0xa6   :  { %v460_v17 = vpop.permute.xlu0 %459 }
  0xa7   :  { %v475_v21 = vpop.permute.xlu1 %474  ;;  %v1464_v51 = vadd.f32 %v491_v18, %v460_v17  ;;  %v1466_v52 = vadd.f32 %v495_v19, %v460_v17 }
  0xa8   :  { %v1468_v53 = vadd.f32 %v491_v18, %v475_v21  ;;  %v1470_v54 = vadd.f32 %v495_v19, %v475_v21 }
  0xaa   :  { %v470_v31 = vpop.permute.xlu0 %469 }
  0xab   :  { %v485_v50 = vpop.permute.xlu1 %484  ;;  %v1472_v62 = vadd.f32 %v491_v18, %v470_v31  ;;  %v1474_v63 = vadd.f32 %v495_v19, %v470_v31 }
  0xac   :  { %v1476_v0 = vadd.f32 %v491_v18, %v485_v50  ;;  %v1478_v1 = vadd.f32 %v495_v19, %v485_v50 }
  0xae   :  { %v480_v59 = vpop.permute.xlu0 %479 }
  0xaf   :  { %v1480_v8 = vadd.f32 %v491_v18, %v480_v59  ;;  %v1482_v9 = vadd.f32 %v495_v19, %v480_v59 }
 0x110   :  { %v295_v44 = vpop.f32.mrf.mxu0  ;;  %v343_v45 = vpop.f32.mrf.mxu1 }
 0x111   :  { %v530_v48 = vmul.f32 2.0, %v295_v44  ;;  %v546_v49 = vmul.f32 2.0, %v343_v45 }
 0x112   :  { %v297_v55 = vpop.f32.mrf.mxu0  ;;  %v345_v56 = vpop.f32.mrf.mxu1 }
 0x113   :  { %v562_v57 = vsub.f32 %v498_v24, %v530_v48  ;;  %v578_v58 = vsub.f32 %v514_v39, %v546_v49  ;;  %v531_v60 = vmul.f32 2.0, %v297_v55  ;;  %v547_v61 = vmul.f32 2.0, %v345_v56 }
 0x114   :  { %v301_v2 = vpop.f32.mrf.mxu0  ;;  %v349_v3 = vpop.f32.mrf.mxu1 }
 0x115   :  { %v594_v4 = vmax.f32 %v562_v57, 0.0  ;;  %v610_v5 = vmax.f32 %v578_v58, 0.0  ;;  %v563_v6 = vsub.f32 %v499_v25, %v531_v60  ;;  %v579_v7 = vsub.f32 %v515_v43, %v547_v61 }
 0x116   :  { %v532_v10 = vmul.f32 2.0, %v301_v2  ;;  %v548_v11 = vmul.f32 2.0, %v349_v3  ;;  %v303_v12 = vpop.f32.mrf.mxu0  ;;  %v351_v13 = vpop.f32.mrf.mxu1 }
 0x117   :  { %v626_v14 = vsub.f32 0.0, %v594_v4  ;;  %v642_v15 = vsub.f32 0.0, %v610_v5  ;;  %v595_v16 = vmax.f32 %v563_v6, 0.0  ;;  %v611_v17 = vmax.f32 %v579_v7, 0.0 }
 0x118   :  { %v564_v21 = vsub.f32 %v1438_v29, %v532_v10  ;;  %v580_v24 = vsub.f32 %v516_v41, %v548_v11  ;;  %v533_v31 = vmul.f32 2.0, %v303_v12  ;;  %v549_v39 = vmul.f32 2.0, %v351_v13  ;;  %v307_v44 = vpop.f32.mrf.mxu0  ;;  %v355_v25 = vpop.f32.mrf.mxu1 }
 0x119   :  { %v659_v18 = vmul.f32 %v1428_v22, %v626_v14  ;;  %v675_v19 = vmul.f32 %v1428_v22, %v642_v15  ;;  %v627_v43 = vsub.f32 0.0, %v595_v16  ;;  %v643_v45 = vsub.f32 0.0, %v611_v17 }
 0x11a   :  { %v596_v48 = vmax.f32 %v564_v21, 0.0  ;;  %v612_v49 = vmax.f32 %v580_v24, 0.0  ;;  %v565_v50 = vsub.f32 %v1440_v30, %v533_v31  ;;  %v581_v55 = vsub.f32 %v1458_v42, %v549_v39  ;;  %v309_v56 = vpop.f32.mrf.mxu0  ;;  %v357_v59 = vpop.f32.mrf.mxu1 }
 0x11b   :  { %v691_v57 = vmul.f32 1.442695, %v659_v18  ;;  %v723_v29 = vmul.f32 1.442695, %v675_v19  ;;  %v660_v41 = vmul.f32 %v1428_v22, %v627_v43  ;;  %v676_v58 = vmul.f32 %v1428_v22, %v643_v45 }
 0x11c   :  { %v628_v60 = vsub.f32 0.0, %v596_v48  ;;  %v644_v61 = vsub.f32 0.0, %v612_v49  ;;  %v597_v2 = vmax.f32 %v565_v50, 0.0  ;;  %v613_v3 = vmax.f32 %v581_v55, 0.0  ;;  %v313_v7 = vpop.f32.mrf.mxu0  ;;  %v361_v14 = vpop.f32.mrf.mxu1 }
 0x11d   :  { %989 = vpow2.f32 %v691_v57  ;;  %v693_v4 = vmul.f32 1.442695, %v660_v41  ;;  %v725_v5 = vmul.f32 1.442695, %v676_v58  ;;  %v534_v6 = vmul.f32 2.0, %v307_v44 }
 0x11e   :  { %991 = vpow2.f32 %v723_v29  ;;  %v661_v30 = vmul.f32 %v1428_v22, %v628_v60  ;;  %v677_v42 = vmul.f32 %v1428_v22, %v644_v61  ;;  %v629_v10 = vsub.f32 0.0, %v597_v2  ;;  %v315_v44 = vpop.f32.mrf.mxu0  ;;  %v363_v48 = vpop.f32.mrf.mxu1 }
 0x11f   :  { %993 = vpow2.f32 %v693_v4  ;;  %v645_v11 = vsub.f32 0.0, %v613_v3  ;;  %v566_v12 = vsub.f32 %v1426_v20, %v534_v6  ;;  %v550_v13 = vmul.f32 2.0, %v355_v25 }
 0x120   :  { %995 = vpow2.f32 %v725_v5  ;;  %v695_v15 = vmul.f32 1.442695, %v661_v30  ;;  %v727_v16 = vmul.f32 1.442695, %v677_v42  ;;  %v662_v17 = vmul.f32 %v1428_v22, %v629_v10  ;;  %v319_v29 = vpop.f32.mrf.mxu0  ;;  %v367_v4 = vpop.f32.mrf.mxu1 }
 0x121   :  { %v678_v21 = vmul.f32 %v1428_v22, %v645_v11  ;;  %v598_v24 = vmax.f32 %v566_v12, 0.0  ;;  %v582_v31 = vsub.f32 %v1464_v51, %v550_v13  ;;  %v535_v39 = vmul.f32 2.0, %v309_v56 }
 0x122   :  { %997 = vpow2.f32 %v695_v15  ;;  %v697_v18 = vmul.f32 1.442695, %v662_v17  ;;  %v551_v19 = vmul.f32 2.0, %v357_v59  ;;  %v536_v43 = vmul.f32 2.0, %v313_v7  ;;  %v321_v10 = vpop.f32.mrf.mxu0 }
 0x123   :  { %999 = vpow2.f32 %v727_v16  ;;  %v729_v20 = vmul.f32 1.442695, %v678_v21  ;;  %v630_v25 = vsub.f32 0.0, %v598_v24  ;;  %v614_v45 = vmax.f32 %v582_v31, 0.0  ;;  %v369_v21 = vpop.f32.mrf.mxu1 }
 0x124   :  { %1001 = vpow2.f32 %v697_v18  ;;  %v567_v49 = vsub.f32 %v1430_v23, %v535_v39  ;;  %v583_v50 = vsub.f32 %v1466_v52, %v551_v19  ;;  %v568_v55 = vsub.f32 %v1434_v27, %v536_v43 }
 0x125   :  { %1003 = vpow2.f32 %v729_v20  ;;  %v663_v51 = vmul.f32 %v1428_v22, %v630_v25  ;;  %v646_v56 = vsub.f32 0.0, %v614_v45  ;;  %v552_v57 = vmul.f32 2.0, %v361_v14  ;;  %v325_v45 = vpop.f32.mrf.mxu0 }
 0x126   :  { %v599_v41 = vmax.f32 %v567_v49, 0.0  ;;  %v615_v58 = vmax.f32 %v583_v50, 0.0  ;;  %v600_v59 = vmax.f32 %v568_v55, 0.0  ;;  %v537_v60 = vmul.f32 2.0, %v315_v44 }
 0x127   :  { %v699_v61 = vmul.f32 1.442695, %v663_v51  ;;  %v679_v2 = vmul.f32 %v1428_v22, %v646_v56  ;;  %v584_v3 = vsub.f32 %v1460_v46, %v552_v57  ;;  %v553_v23 = vmul.f32 2.0, %v363_v48 }
 0x128   :  { %v631_v52 = vsub.f32 0.0, %v599_v41  ;;  %v647_v5 = vsub.f32 0.0, %v615_v58  ;;  %v632_v27 = vsub.f32 0.0, %v600_v59  ;;  %v569_v6 = vsub.f32 %v1436_v28, %v537_v60  ;;  %v373_v41 = vpop.f32.mrf.mxu1 }
 0x129   :  { %1005 = vpow2.f32 %v699_v61  ;;  %v731_v7 = vmul.f32 1.442695, %v679_v2  ;;  %v616_v30 = vmax.f32 %v584_v3, 0.0  ;;  %v585_v42 = vsub.f32 %v1462_v47, %v553_v23 }
 0x12a   :  { %v990_v11 = vpop.eup %989  ;;  %v664_v12 = vmul.f32 %v1428_v22, %v631_v52  ;;  %v680_v13 = vmul.f32 %v1428_v22, %v647_v5  ;;  %v665_v46 = vmul.f32 %v1428_v22, %v632_v27  ;;  %v601_v14 = vmax.f32 %v569_v6, 0.0 }
 0x12b   :  { %v992_v15 = vpop.eup %991  ;;  %v756_v16 = vmul.f32 %v990_v11, %v1432_v26  ;;  %1007 = vpow2.f32 %v731_v7  ;;  %v648_v17 = vsub.f32 0.0, %v616_v30  ;;  %v617_v28 = vmax.f32 %v585_v42, 0.0  ;;  %v375_v42 = vpop.f32.mrf.mxu1 }
 0x12c   :  { %v994_v24 = vpop.eup %993  ;;  %v772_v31 = vmul.f32 %v992_v15, %v1432_v26  ;;  %v701_v47 = vmul.f32 1.442695, %v664_v12  ;;  %v733_v39 = vmul.f32 1.442695, %v680_v13  ;;  %v703_v44 = vmul.f32 1.442695, %v665_v46 }
 0x12d   :  { %v996_v18 = vpop.eup %995  ;;  %788 = vst [vmem:[#allocation5] sm:$0xff] %v756_v16  ;;  %v757_v19 = vmul.f32 %v994_v24, %v1432_v26  ;;  %v681_v43 = vmul.f32 %v1428_v22, %v648_v17  ;;  %v633_v20 = vsub.f32 0.0, %v601_v14  ;;  %v649_v25 = vsub.f32 0.0, %v617_v28 }
 0x12e   :  { %804 = vst [vmem:[#allocation5 + $0x80] sm:$0xff] %v772_v31  ;;  %v773_v48 = vmul.f32 %v996_v18, %v1432_v26  ;;  %1009 = vpow2.f32 %v701_v47  ;;  %v538_v49 = vmul.f32 2.0, %v319_v29  ;;  %v554_v50 = vmul.f32 2.0, %v367_v4  ;;  %v327_v4 = vpop.f32.mrf.mxu0  ;;  %v379_v18 = vpop.f32.mrf.mxu1 }
 0x12f   :  { %v998_v55 = vpop.eup %997  ;;  %789 = vst [vmem:[#allocation5 + $0x8] sm:$0xff] %v757_v19  ;;  %1011 = vpow2.f32 %v733_v39  ;;  %v735_v51 = vmul.f32 1.442695, %v681_v43  ;;  %v666_v56 = vmul.f32 %v1428_v22, %v633_v20  ;;  %v682_v57 = vmul.f32 %v1428_v22, %v649_v25 }
 0x130   :  { %v1000_v58 = vpop.eup %999  ;;  %805 = vst [vmem:[#allocation5 + $0x88] sm:$0xff] %v773_v48  ;;  %v758_v59 = vmul.f32 %v998_v55, %v1432_v26  ;;  %1013 = vpow2.f32 %v703_v44  ;;  %v570_v60 = vsub.f32 %v1446_v34, %v538_v49  ;;  %v586_v61 = vsub.f32 %v1472_v62, %v554_v50  ;;  %v331_v16 = vpop.f32.mrf.mxu0 }
 0x131   :  { %v1002_v29 = vpop.eup %1001  ;;  %v774_v2 = vmul.f32 %v1000_v58, %v1432_v26  ;;  %1015 = vpow2.f32 %v735_v51  ;;  %v705_v3 = vmul.f32 1.442695, %v666_v56  ;;  %v737_v23 = vmul.f32 1.442695, %v682_v57  ;;  %v381_v58 = vpop.f32.mrf.mxu1 }
 0x132   :  { %v1004_v52 = vpop.eup %1003  ;;  %790 = vst [vmem:[#allocation5 + $0x10] sm:$0xff] %v758_v59  ;;  %v759_v5 = vmul.f32 %v1002_v29, %v1432_v26  ;;  %v602_v27 = vmax.f32 %v570_v60, 0.0  ;;  %v618_v6 = vmax.f32 %v586_v61, 0.0  ;;  %v539_v7 = vmul.f32 2.0, %v321_v10  ;;  %v333_v50 = vpop.f32.mrf.mxu0 }
 0x133   :  { %806 = vst [vmem:[#allocation5 + $0x90] sm:$0xff] %v774_v2  ;;  %v775_v30 = vmul.f32 %v1004_v52, %v1432_v26  ;;  %1017 = vpow2.f32 %v705_v3  ;;  %v555_v34 = vmul.f32 2.0, %v369_v21  ;;  %v540_v62 = vmul.f32 2.0, %v325_v45 }
 0x134   :  { %791 = vst [vmem:[#allocation5 + $0x18] sm:$0xff] %v759_v5  ;;  %1019 = vpow2.f32 %v737_v23  ;;  %v634_v11 = vsub.f32 0.0, %v602_v27  ;;  %v650_v12 = vsub.f32 0.0, %v618_v6  ;;  %v571_v13 = vsub.f32 %v1448_v35, %v539_v7  ;;  %v337_v5 = vpop.f32.mrf.mxu0 }
 0x135   :  { %807 = vst [vmem:[#allocation5 + $0x98] sm:$0xff] %v775_v30  ;;  %v587_v46 = vsub.f32 %v1474_v63, %v555_v34  ;;  %v572_v14 = vsub.f32 %v1442_v32, %v540_v62  ;;  %v556_v15 = vmul.f32 2.0, %v373_v41  ;;  %v541_v10 = vmul.f32 2.0, %v327_v4 }
 0x136   :  { %v1006_v17 = vpop.eup %1005  ;;  %v667_v28 = vmul.f32 %v1428_v22, %v634_v11  ;;  %v683_v21 = vmul.f32 %v1428_v22, %v650_v12  ;;  %v603_v24 = vmax.f32 %v571_v13, 0.0  ;;  %v557_v31 = vmul.f32 2.0, %v375_v42  ;;  %v385_v11 = vpop.f32.mrf.mxu1 }
 0x137   :  { %v760_v47 = vmul.f32 %v1006_v17, %v1432_v26  ;;  %v619_v39 = vmax.f32 %v587_v46, 0.0  ;;  %v604_v44 = vmax.f32 %v572_v14, 0.0  ;;  %v588_v35 = vsub.f32 %v1468_v53, %v556_v15 }
 0x138   :  { %v1008_v63 = vpop.eup %1007  ;;  %v707_v19 = vmul.f32 1.442695, %v667_v28  ;;  %v739_v32 = vmul.f32 1.442695, %v683_v21  ;;  %v635_v43 = vsub.f32 0.0, %v603_v24  ;;  %v573_v20 = vsub.f32 %v1444_v33, %v541_v10  ;;  %v339_v21 = vpop.f32.mrf.mxu0 }
 0x139   :  { %792 = vst [vmem:[#allocation5 + $0x20] sm:$0xff] %v760_v47  ;;  %v776_v25 = vmul.f32 %v1008_v63, %v1432_v26  ;;  %v651_v45 = vsub.f32 0.0, %v619_v39  ;;  %v636_v48 = vsub.f32 0.0, %v604_v44  ;;  %v620_v49 = vmax.f32 %v588_v35, 0.0 }
 0x13a   :  { %1021 = vpow2.f32 %v707_v19  ;;  %v668_v55 = vmul.f32 %v1428_v22, %v635_v43  ;;  %v605_v51 = vmax.f32 %v573_v20, 0.0  ;;  %v589_v53 = vsub.f32 %v1470_v54, %v557_v31 }
 0x13b   :  { %v1010_v56 = vpop.eup %1009  ;;  %808 = vst [vmem:[#allocation5 + $0xa0] sm:$0xff] %v776_v25  ;;  %1023 = vpow2.f32 %v739_v32  ;;  %v684_v57 = vmul.f32 %v1428_v22, %v651_v45  ;;  %v669_v33 = vmul.f32 %v1428_v22, %v636_v48  ;;  %v652_v41 = vsub.f32 0.0, %v620_v49 }
 0x13c   :  { %v1012_v59 = vpop.eup %1011  ;;  %v761_v60 = vmul.f32 %v1010_v56, %v1432_v26  ;;  %v709_v61 = vmul.f32 1.442695, %v668_v55  ;;  %v637_v29 = vsub.f32 0.0, %v605_v51  ;;  %v621_v2 = vmax.f32 %v589_v53, 0.0 }
 0x13d   :  { %v1014_v3 = vpop.eup %1013  ;;  %v777_v23 = vmul.f32 %v1012_v59, %v1432_v26  ;;  %v741_v4 = vmul.f32 1.442695, %v684_v57  ;;  %v711_v54 = vmul.f32 1.442695, %v669_v33  ;;  %v685_v52 = vmul.f32 %v1428_v22, %v652_v41 }
 0x13e   :  { %v1016_v27 = vpop.eup %1015  ;;  %793 = vst [vmem:[#allocation5 + $0x28] sm:$0xff] %v761_v60  ;;  %v762_v6 = vmul.f32 %v1014_v3, %v1432_v26  ;;  %1025 = vpow2.f32 %v709_v61  ;;  %v670_v7 = vmul.f32 %v1428_v22, %v637_v29  ;;  %v653_v30 = vsub.f32 0.0, %v621_v2 }
 0x13f   :  { %809 = vst [vmem:[#allocation5 + $0xa8] sm:$0xff] %v777_v23  ;;  %v778_v34 = vmul.f32 %v1016_v27, %v1432_v26  ;;  %1027 = vpow2.f32 %v741_v4  ;;  %v743_v62 = vmul.f32 1.442695, %v685_v52  ;;  %v542_v42 = vmul.f32 2.0, %v331_v16 }
 0x140   :  { %v1018_v12 = vpop.eup %1017  ;;  %794 = vst [vmem:[#allocation5 + $0x30] sm:$0xff] %v762_v6  ;;  %1029 = vpow2.f32 %v711_v54  ;;  %v713_v13 = vmul.f32 1.442695, %v670_v7  ;;  %v686_v46 = vmul.f32 %v1428_v22, %v653_v30  ;;  %v558_v14 = vmul.f32 2.0, %v379_v18  ;;  %v387_v18 = vpop.f32.mrf.mxu1 }
 0x141   :  { %v1020_v15 = vpop.eup %1019  ;;  %810 = vst [vmem:[#allocation5 + $0xb0] sm:$0xff] %v778_v34  ;;  %v763_v10 = vmul.f32 %v1018_v12, %v1432_v26  ;;  %1031 = vpow2.f32 %v743_v62  ;;  %v574_v17 = vsub.f32 %v1454_v38, %v542_v42  ;;  %v543_v28 = vmul.f32 2.0, %v333_v50 }
 0x142   :  { %v779_v24 = vmul.f32 %v1020_v15, %v1432_v26  ;;  %1033 = vpow2.f32 %v713_v13  ;;  %v745_v16 = vmul.f32 1.442695, %v686_v46  ;;  %v590_v31 = vsub.f32 %v1480_v8, %v558_v14 }
 0x143   :  { %795 = vst [vmem:[#allocation5 + $0x38] sm:$0xff] %v763_v10  ;;  %v606_v47 = vmax.f32 %v574_v17, 0.0  ;;  %v575_v39 = vsub.f32 %v1456_v40, %v543_v28  ;;  %v559_v44 = vmul.f32 2.0, %v381_v58  ;;  %v544_v35 = vmul.f32 2.0, %v337_v5 }
 0x144   :  { %811 = vst [vmem:[#allocation5 + $0xb8] sm:$0xff] %v779_v24  ;;  %1035 = vpow2.f32 %v745_v16  ;;  %v622_v63 = vmax.f32 %v590_v31, 0.0  ;;  %v560_v19 = vmul.f32 2.0, %v385_v11  ;;  %v545_v38 = vmul.f32 2.0, %v339_v21 }
 0x145   :  { %v638_v32 = vsub.f32 0.0, %v606_v47  ;;  %v607_v43 = vmax.f32 %v575_v39, 0.0  ;;  %v591_v20 = vsub.f32 %v1482_v9, %v559_v44  ;;  %v576_v25 = vsub.f32 %v1450_v36, %v544_v35 }
 0x146   :  { %v654_v45 = vsub.f32 0.0, %v622_v63  ;;  %v592_v8 = vsub.f32 %v1476_v0, %v560_v19  ;;  %v577_v48 = vsub.f32 %v1452_v37, %v545_v38  ;;  %v561_v40 = vmul.f32 2.0, %v387_v18 }
 0x147   :  { %v1022_v49 = vpop.eup %1021  ;;  %v671_v50 = vmul.f32 %v1428_v22, %v638_v32  ;;  %v639_v55 = vsub.f32 0.0, %v607_v43  ;;  %v623_v51 = vmax.f32 %v591_v20, 0.0  ;;  %v608_v53 = vmax.f32 %v576_v25, 0.0 }
 0x148   :  { %v1024_v56 = vpop.eup %1023  ;;  %v764_v57 = vmul.f32 %v1022_v49, %v1432_v26  ;;  %v687_v33 = vmul.f32 %v1428_v22, %v654_v45  ;;  %v624_v9 = vmax.f32 %v592_v8, 0.0  ;;  %v609_v41 = vmax.f32 %v577_v48, 0.0 }
 0x149   :  { %v780_v36 = vmul.f32 %v1024_v56, %v1432_v26  ;;  %v715_v58 = vmul.f32 1.442695, %v671_v50  ;;  %v672_v0 = vmul.f32 %v1428_v22, %v639_v55  ;;  %v655_v37 = vsub.f32 0.0, %v623_v51 }
 0x14a   :  { %796 = vst [vmem:[#allocation5 + $0x40] sm:$0xff] %v764_v57  ;;  %v747_v59 = vmul.f32 1.442695, %v687_v33  ;;  %v640_v60 = vsub.f32 0.0, %v608_v53  ;;  %v656_v61 = vsub.f32 0.0, %v624_v9  ;;  %v641_v29 = vsub.f32 0.0, %v609_v41 }
 0x14b   :  { %v1026_v2 = vpop.eup %1025  ;;  %812 = vst [vmem:[#allocation5 + $0xc0] sm:$0xff] %v780_v36  ;;  %1037 = vpow2.f32 %v715_v58  ;;  %v717_v3 = vmul.f32 1.442695, %v672_v0  ;;  %v688_v23 = vmul.f32 %v1428_v22, %v655_v37  ;;  %v593_v4 = vsub.f32 %v1478_v1, %v561_v40 }
 0x14c   :  { %v1028_v54 = vpop.eup %1027  ;;  %v765_v52 = vmul.f32 %v1026_v2, %v1432_v26  ;;  %1039 = vpow2.f32 %v747_v59  ;;  %v673_v5 = vmul.f32 %v1428_v22, %v640_v60  ;;  %v689_v27 = vmul.f32 %v1428_v22, %v656_v61 }
 0x14d   :  { %v1030_v6 = vpop.eup %1029  ;;  %v781_v7 = vmul.f32 %v1028_v54, %v1432_v26  ;;  %1041 = vpow2.f32 %v717_v3  ;;  %v749_v30 = vmul.f32 1.442695, %v688_v23  ;;  %v674_v34 = vmul.f32 %v1428_v22, %v641_v29 }
 0x14e   :  { %v1032_v62 = vpop.eup %1031  ;;  %797 = vst [vmem:[#allocation5 + $0x48] sm:$0xff] %v765_v52  ;;  %v766_v42 = vmul.f32 %v1030_v6, %v1432_v26  ;;  %v719_v1 = vmul.f32 1.442695, %v673_v5  ;;  %v751_v11 = vmul.f32 1.442695, %v689_v27  ;;  %v625_v12 = vmax.f32 %v593_v4, 0.0 }
 0x14f   :  { %v1034_v13 = vpop.eup %1033  ;;  %813 = vst [vmem:[#allocation5 + $0xc8] sm:$0xff] %v781_v7  ;;  %v782_v46 = vmul.f32 %v1032_v62, %v1432_v26  ;;  %1043 = vpow2.f32 %v749_v30  ;;  %v721_v14 = vmul.f32 1.442695, %v674_v34 }
 0x150   :  { %798 = vst [vmem:[#allocation5 + $0x50] sm:$0xff] %v766_v42  ;;  %v767_v15 = vmul.f32 %v1034_v13, %v1432_v26  ;;  %1045 = vpow2.f32 %v719_v1  ;;  %v657_v10 = vsub.f32 0.0, %v625_v12 }
 0x151   :  { %v1036_v17 = vpop.eup %1035  ;;  %814 = vst [vmem:[#allocation5 + $0xd0] sm:$0xff] %v782_v46  ;;  %1047 = vpow2.f32 %v751_v11 }
 0x152   :  { %799 = vst [vmem:[#allocation5 + $0x58] sm:$0xff] %v767_v15  ;;  %v783_v28 = vmul.f32 %v1036_v17, %v1432_v26  ;;  %1049 = vpow2.f32 %v721_v14  ;;  %v690_v21 = vmul.f32 %v1428_v22, %v657_v10 }
 0x154   :  { %815 = vst [vmem:[#allocation5 + $0xd8] sm:$0xff] %v783_v28  ;;  %v753_v24 = vmul.f32 1.442695, %v690_v21 }
 0x156   :  { %1051 = vpow2.f32 %v753_v24 }
 0x158   :  { %v1038_v16 = vpop.eup %1037 }
 0x159   :  { %v1040_v31 = vpop.eup %1039  ;;  %v768_v47 = vmul.f32 %v1038_v16, %v1432_v26 }
 0x15a   :  { %v1042_v39 = vpop.eup %1041  ;;  %v784_v44 = vmul.f32 %v1040_v31, %v1432_v26 }
 0x15b   :  { %800 = vst [vmem:[#allocation5 + $0x60] sm:$0xff] %v768_v47  ;;  %v769_v35 = vmul.f32 %v1042_v39, %v1432_v26 }
 0x15c   :  { %v1044_v18 = vpop.eup %1043  ;;  %816 = vst [vmem:[#allocation5 + $0xe0] sm:$0xff] %v784_v44 }
 0x15d   :  { %v1046_v63 = vpop.eup %1045  ;;  %801 = vst [vmem:[#allocation5 + $0x68] sm:$0xff] %v769_v35  ;;  %v785_v19 = vmul.f32 %v1044_v18, %v1432_v26 }
 0x15e   :  { %v1048_v22 = vpop.eup %1047  ;;  %v770_v38 = vmul.f32 %v1046_v63, %v1432_v26 }
 0x15f   :  { %v1050_v32 = vpop.eup %1049  ;;  %817 = vst [vmem:[#allocation5 + $0xe8] sm:$0xff] %v785_v19  ;;  %v786_v43 = vmul.f32 %v1048_v22, %v1432_v26 }
 0x160   :  { %802 = vst [vmem:[#allocation5 + $0x70] sm:$0xff] %v770_v38  ;;  %v771_v20 = vmul.f32 %v1050_v32, %v1432_v26 }
 0x161   :  { %818 = vst [vmem:[#allocation5 + $0xf0] sm:$0xff] %v786_v43 }
 0x162   :  { %803 = vst [vmem:[#allocation5 + $0x78] sm:$0xff] %v771_v20 }
 0x163   :  { %v1052_v25 = vpop.eup %1051 }
 0x164   :  { %v787_v45 = vmul.f32 %v1052_v25, %v1432_v26 }
 0x166   :  { %819 = vst [vmem:[#allocation5 + $0xf8] sm:$0xff] %v787_v45 }
 0x167   :  { %1076 = shalt.err (!%p1073_p9)
}
 0x168   :  { %s1092_s22 = smov 256   ;;  %s1093_s23 = smov 16  }
 0x169   :  { %831 = dma.vmem_to_hbm [thread:$0]  %s826_s21, 4096, %s1583_s5, [#allocation3], %s1092_s22, %s1092_s22, %s1093_s23  }
 0x16a   :  { %1087 = dma.done.wait [#allocation3], 4096  }
 0x16b   :  { %1088 = vsyncadd [#allocation3], 4294963200 }
 0x16c   :  { %835 = vsyncpa [#allocation3], 1 }
 0x16d   :  { %836 = vsyncpa [#allocation4], 1 }

</bundles_post_ra>
